<compile_context>
chip_gen: v7x
topology: tpu7x:2x2x1
jax: 0.10.0
libtpu: 0.0.40
codegen_flags: <defaults>
</compile_context>

<pallas_src>
import functools

import jax
import jax.numpy as jnp
from jax.experimental import pallas as pl
from jax.experimental.pallas import tpu as pltpu

BN_EPS = 1e-5
MXU_DTYPE = jnp.bfloat16        # MXU operand dtype (f32 accumulation everywhere)
LANE = 128
SUBLANE = 8
TM_CAP = 1024                   # max row tile (perf review: tm 512-1024)
TK_CAP = 1024                   # max A-column (reduction) tile
HW_RESIDENT_BYTES = 6 * 1024 * 1024    # resident-hW budget (x2 buffers stays v7x-safe)
PHASE1_VMEM_LIMIT = 48 * 1024 * 1024   # explicit scoped-VMEM limit (< v7x 64 MiB physical)


def _ceil_to(x, m):
    return ((x + m - 1) // m) * m


def _largest_aligned_tile(n_pad, cap):
    """Largest multiple of LANE that divides n_pad (itself a LANE multiple), <= cap."""
    best = LANE
    t = LANE
    while t <= min(cap, n_pad):
        if n_pad % t == 0:
            best = t
        t += LANE
    return best


def _pad2(x, rows, cols):
    pr, pc = rows - x.shape[0], cols - x.shape[1]
    if pr or pc:
        return jnp.pad(x, ((0, pr), (0, pc)))
    return x


# ---------------------------------------------------------------------------
# Phase 0: hW = h @ W   (row-tiled so the FxF matmul is done once per row)
# ---------------------------------------------------------------------------
def feature_matmul_kernel(h_ref, w_ref, hw_ref):
    hw_ref[...] = jnp.dot(
        h_ref[...].astype(MXU_DTYPE), w_ref[...].astype(MXU_DTYPE),
        preferred_element_type=jnp.float32,
    ).astype(hw_ref.dtype)


# ---------------------------------------------------------------------------
# Phase 1: z = A @ hW + h_in  (+ per-row-tile sum / sumsq for BatchNorm)
# ---------------------------------------------------------------------------
def aggregate_kernel(a_ref, hw_ref, hin_ref, z_ref, psum_ref, psumsq_ref,
                     acc_ref, *, tk, hw_resident):
    k = pl.program_id(1)

    # In-kernel bf16 cast of the A tile (no-op if the caller stored A in bf16).
    a = a_ref[...].astype(MXU_DTYPE)
    if hw_resident:
        # hW is fully VMEM-resident; slice the k-th reduction chunk.
        off = pl.multiple_of(k * tk, tk)
        hw = hw_ref[pl.ds(off, tk), :]
    else:
        hw = hw_ref[...]
    part = jnp.dot(a, hw, preferred_element_type=jnp.float32)

    @pl.when(k == 0)
    def _first():                     # write, don't zero-init + read-modify-write
        acc_ref[...] = part

    @pl.when(k > 0)
    def _rest():
        acc_ref[...] += part

    @pl.when(k == pl.num_programs(1) - 1)
    def _finalize():
        z = acc_ref[...] + hin_ref[...]
        z_ref[...] = z
        psum_ref[...] = jnp.sum(z, axis=0, keepdims=True)[None]
        psumsq_ref[...] = jnp.sum(z * z, axis=0, keepdims=True)[None]


# ---------------------------------------------------------------------------
# Phase 2: out = relu(z * scale + shift)   (BatchNorm affine folded)
# ---------------------------------------------------------------------------
def bn_relu_kernel(z_ref, scale_ref, shift_ref, o_ref):
    zn = z_ref[...] * scale_ref[...] + shift_ref[...]
    o_ref[...] = jnp.maximum(zn, 0.0).astype(o_ref.dtype)


@jax.jit
def op_module_forward(a_norm, h, h_in, w, b, gamma, beta):
    n, f = h.shape
    f_pad = _ceil_to(f, LANE)
    n_pad = _ceil_to(n, LANE)
    tm = _largest_aligned_tile(n_pad, TM_CAP)
    tk = _largest_aligned_tile(n_pad, TK_CAP)
    gm, gk = n_pad // tm, n_pad // tk

    _ = b  # pre-BN bias is cancelled exactly by the batch-mean subtraction

    # ----- operand prep ------------------------------------------------------
    # A: no wrapper-side pad/cast pass when N is already 128-aligned; the
    # kernel casts tiles to bf16.  (A persisted in bf16 by the caller also
    # flows straight through.)  If padding is unavoidable, store the padded
    # copy in bf16 (fewer HBM bytes than a padded f32 copy).
    if n_pad == n:
        a_p = a_norm
    else:
        a_p = _pad2(a_norm, n_pad, n_pad).astype(MXU_DTYPE)

    h_p = _pad2(h, n_pad, f_pad).astype(MXU_DTYPE)
    hin_p = _pad2(h_in, n_pad, f_pad).astype(jnp.float32)
    w_p = _pad2(w, f_pad, f_pad).astype(MXU_DTYPE)
    gamma_p = jnp.pad(gamma, (0, f_pad - f)).astype(jnp.float32)
    beta_p = jnp.pad(beta, (0, f_pad - f)).astype(jnp.float32)

    # ----- phase 0: hW = h @ W -----------------------------------------------
    hw = pl.pallas_call(
        feature_matmul_kernel,
        out_shape=jax.ShapeDtypeStruct((n_pad, f_pad), MXU_DTYPE),
        grid_spec=pltpu.PrefetchScalarGridSpec(
            num_scalar_prefetch=0, grid=(gm,),
            in_specs=[pl.BlockSpec((tm, f_pad), lambda i: (i, 0)),
                      pl.BlockSpec((f_pad, f_pad), lambda i: (0, 0))],
            out_specs=pl.BlockSpec((tm, f_pad), lambda i: (i, 0))),
        compiler_params=pltpu.CompilerParams(dimension_semantics=("parallel",)),
        cost_estimate=pl.CostEstimate(
            flops=2 * n_pad * f_pad * f_pad, transcendentals=0,
            bytes_accessed=(2 * n_pad * f_pad + f_pad * f_pad) * 2),
    )(h_p, w_p)

    # ----- phase 1: z = A @ hW + h_in ; per-row-tile sum & sumsq --------------
    hw_resident = (n_pad * f_pad * 2) <= HW_RESIDENT_BYTES
    if hw_resident:
        # DMA'd once (constant block index); sliced per k step in-kernel.
        hw_spec = pl.BlockSpec((n_pad, f_pad), lambda i, k: (0, 0))
    else:
        hw_spec = pl.BlockSpec((tk, f_pad), lambda i, k: (k, 0))

    a_bytes = 2 if n_pad != n else a_norm.dtype.itemsize
    kernel1 = functools.partial(aggregate_kernel, tk=tk, hw_resident=hw_resident)

    z, psum, psumsq = pl.pallas_call(
        kernel1,
        out_shape=(jax.ShapeDtypeStruct((n_pad, f_pad), jnp.float32),
                   jax.ShapeDtypeStruct((gm, 1, f_pad), jnp.float32),
                   jax.ShapeDtypeStruct((gm, 1, f_pad), jnp.float32)),
        grid_spec=pltpu.PrefetchScalarGridSpec(
            num_scalar_prefetch=0, grid=(gm, gk),
            in_specs=[pl.BlockSpec((tm, tk), lambda i, k: (i, k)),
                      hw_spec,
                      pl.BlockSpec((tm, f_pad), lambda i, k: (i, 0))],
            out_specs=(pl.BlockSpec((tm, f_pad), lambda i, k: (i, 0)),
                       pl.BlockSpec((1, 1, f_pad), lambda i, k: (i, 0, 0)),
                       pl.BlockSpec((1, 1, f_pad), lambda i, k: (i, 0, 0))),
            scratch_shapes=[pltpu.VMEM((tm, f_pad), jnp.float32)]),
        compiler_params=pltpu.CompilerParams(
            dimension_semantics=("parallel", "arbitrary"),
            vmem_limit_bytes=PHASE1_VMEM_LIMIT),
        cost_estimate=pl.CostEstimate(
            flops=2 * n_pad * n_pad * f_pad, transcendentals=0,
            bytes_accessed=(n_pad * n_pad * a_bytes
                            + (1 if hw_resident else gm) * n_pad * f_pad * 2
                            + 2 * n_pad * f_pad * 4)),
    )(a_p, hw, hin_p)

    # ----- fold global BatchNorm statistics into per-feature scale/shift -----
    # Padded rows of A / h_in are zero, so they contribute nothing; divide by
    # the true N.  (Raw-moment variance is fine here; see Welford TODO above.)
    sum_tot = jnp.sum(psum[:, 0, :], axis=0)
    sumsq_tot = jnp.sum(psumsq[:, 0, :], axis=0)
    mean = sum_tot / n
    var = jnp.maximum(sumsq_tot / n - mean * mean, 0.0)   # biased variance
    scale = (gamma_p * jax.lax.rsqrt(var + BN_EPS)).reshape(1, f_pad)
    shift = (beta_p - mean * scale[0]).reshape(1, f_pad)

    # ----- phase 2: normalize + affine + ReLU --------------------------------
    # Emit the unpadded output directly when it stays lane-dense / tile-exact;
    # otherwise keep padded stores (lane density) and slice once at the end.
    out_rows = n if n % tm == 0 else n_pad
    out_cols = f if f_pad == f else f_pad
    out = pl.pallas_call(
        bn_relu_kernel,
        out_shape=jax.ShapeDtypeStruct((out_rows, out_cols), jnp.float32),
        grid_spec=pltpu.PrefetchScalarGridSpec(
            num_scalar_prefetch=0, grid=(gm,),
            in_specs=[pl.BlockSpec((tm, f_pad), lambda i: (i, 0)),
                      pl.BlockSpec((1, f_pad), lambda i: (0, 0)),
                      pl.BlockSpec((1, f_pad), lambda i: (0, 0))],
            out_specs=pl.BlockSpec((tm, f_pad), lambda i: (i, 0))),
        compiler_params=pltpu.CompilerParams(dimension_semantics=("parallel",)),
        cost_estimate=pl.CostEstimate(
            flops=3 * n_pad * f_pad, transcendentals=0,
            bytes_accessed=2 * n_pad * f_pad * 4),
    )(z, scale, shift)

    # dropout omitted: F.dropout result is discarded in the reference code.
    if out_rows == n and out_cols == f:
        return out
    return out[:n, :f]


# ---------------------------------------------------------------------------
# Pure-JAX reference (matmul_dtype lets us precision-match the bf16 MXU path)
# ---------------------------------------------------------------------------
def reference_forward(a_norm, h, h_in, w, b, gamma, beta,
                      matmul_dtype=jnp.float32):
    hw = jnp.dot(h.astype(matmul_dtype), w.astype(matmul_dtype),
                 preferred_element_type=jnp.float32)
    if matmul_dtype != jnp.float32:
        hw = hw.astype(matmul_dtype)
    z = jnp.dot(a_norm.astype(matmul_dtype), hw,
                preferred_element_type=jnp.float32)
    z = z + b[None, :] + h_in
    mean = jnp.mean(z, axis=0, keepdims=True)
    var = jnp.mean((z - mean) ** 2, axis=0, keepdims=True)
    zn = (z - mean) / jnp.sqrt(var + BN_EPS) * gamma[None, :] + beta[None, :]
    return jnp.maximum(zn, 0.0)


def make_inputs(key, n, f):
    k_h, k_hin, k_w, k_b, k_g, k_beta = jax.random.split(key, 6)
    h = jax.random.normal(k_h, (n, f), dtype=jnp.float32)
    h_in = jax.random.normal(k_hin, (n, f), dtype=jnp.float32)
    # Deterministic graph: ring with self-loops, row-normalized adjacency.
    idx = jnp.arange(n)
    adj = (jnp.eye(n)
           + jnp.eye(n)[(idx + 1) % n]
           + jnp.eye(n)[(idx - 1) % n]).astype(jnp.float32)
    a_norm = adj / jnp.sum(adj, axis=1, keepdims=True)
    w = 0.1 * jax.random.normal(k_w, (f, f), dtype=jnp.float32)
    b = 0.1 * jax.random.normal(k_b, (f,), dtype=jnp.float32)
    gamma = 1.0 + 0.1 * jax.random.normal(k_g, (f,), dtype=jnp.float32)
    beta = 0.1 * jax.random.normal(k_beta, (f,), dtype=jnp.float32)
    return a_norm, h, h_in, w, b, gamma, beta


if __name__ == "__main__":
    key = jax.random.PRNGKey(0)
    # (64, 32):    single-tile grid, padded A (bf16 pad path), padded features.
    # (600, 96):   non-power-of-2 N, padded A, padded features, column slice.
    # (1280, 128): multi-tile (gm=gk=2), unpadded f32 A cast in-kernel,
    #              resident hW sliced per k step, direct unpadded output.
    for n, f in [(64, 32), (600, 96), (1280, 128)]:
        key, sub = jax.random.split(key)
        a_norm, h, h_in, w, b, gamma, beta = make_inputs(sub, n, f)

        out = op_module_forward(a_norm, h, h_in, w, b, gamma, beta)
        out = jax.block_until_ready(out)
        assert out.shape == (n, f)

        # Tight check vs a precision-matched (bf16-operand) reference.
        ref_matched = reference_forward(a_norm, h, h_in, w, b, gamma, beta,
                                        matmul_dtype=jnp.bfloat16)
        assert jnp.allclose(out, ref_matched, atol=1e-3, rtol=1e-3), \
            f"mismatch vs precision-matched reference (n={n}, f={f})"

        # Looser check vs the full-f32 reference (bounded by bf16 rounding).
        ref_f32 = reference_forward(a_norm, h, h_in, w, b, gamma, beta)
        assert jnp.allclose(out, ref_f32, atol=5e-2, rtol=5e-2), \
            f"mismatch vs f32 reference (n={n}, f={f})"

    print("KERNEL_OK")
</pallas_src>

<mosaic_0001>
module attributes {stable_mosaic.version = 11 : i64} {
  func.func @aggregate_kernel(%arg0: i32, %arg1: i32, %arg2: memref<128x128xbf16, #tpu.memory_space<vmem>>, %arg3: memref<128x128xbf16, #tpu.memory_space<vmem>>, %arg4: memref<128x128xf32, #tpu.memory_space<vmem>>, %arg5: memref<128x128xf32, #tpu.memory_space<vmem>>, %arg6: memref<1x1x128xf32, #tpu.memory_space<vmem>>, %arg7: memref<1x1x128xf32, #tpu.memory_space<vmem>>, %arg8: memref<128x128xf32, #tpu.memory_space<vmem>>) attributes {dimension_semantics = [#tpu.dimension_semantics<parallel>, #tpu.dimension_semantics<arbitrary>], iteration_bounds = array<i64: 1, 1>, scalar_prefetch = 0 : i64, scratch_operands = 1 : i64, tpu.core_type = #tpu.core_type<tc>, window_params = [{transform_indices = @transform_0, window_bounds = array<i64: 128, 128>}, {pipeline_mode = #tpu.pipeline_mode<synchronous>, transform_indices = @transform_1, window_bounds = array<i64: 128, 128>}, {transform_indices = @transform_2, window_bounds = array<i64: 128, 128>}, {transform_indices = @transform_3, window_bounds = array<i64: 128, 128>}, {transform_indices = @transform_4, window_bounds = array<i64: 1, 1, 128>}, {transform_indices = @transform_5, window_bounds = array<i64: 1, 1, 128>}]} {
    %c0 = arith.constant 0 : index
    %c0_0 = arith.constant 0 : index
    %0 = vector.load %arg2[%c0, %c0_0] : memref<128x128xbf16, #tpu.memory_space<vmem>>, vector<128x128xbf16>
    %c128_i32 = arith.constant 128 : i32
    %1 = arith.muli %arg1, %c128_i32 : i32
    %2 = tpu.assume_multiple %1, 128 : i32
    %3 = arith.index_cast %2 : i32 to index
    %c0_1 = arith.constant 0 : index
    %4 = vector.load %arg3[%3, %c0_1] : memref<128x128xbf16, #tpu.memory_space<vmem>>, vector<128x128xbf16>
    %cst = arith.constant dense<0.000000e+00> : vector<128x128xf32>
    %5 = tpu.matmul %0, %4, %cst {dimension_numbers = #tpu.dot_dimension_numbers<[1], [0], [0], [1], [0, 0, 1, 1], [], []>} : vector<128x128xbf16>, vector<128x128xbf16>, vector<128x128xf32> -> vector<128x128xf32>
    %c0_i32 = arith.constant 0 : i32
    %6 = arith.cmpi eq, %arg1, %c0_i32 : i32
    %7 = arith.extui %6 : i1 to i32
    %c0_i32_2 = arith.constant 0 : i32
    %8 = arith.cmpi ne, %7, %c0_i32_2 : i32
    scf.if %8 {
      %c0_7 = arith.constant 0 : index
      %c0_8 = arith.constant 0 : index
      %15 = vector.load %arg8[%c0_7, %c0_8] : memref<128x128xf32, #tpu.memory_space<vmem>>, vector<128x128xf32>
      tpu.vector_store %arg8[%c0_7, %c0_8], %5 {strides = array<i32>} : memref<128x128xf32, #tpu.memory_space<vmem>>, vector<128x128xf32>,
    } else {
    }
    %c0_i32_3 = arith.constant 0 : i32
    %9 = arith.cmpi sgt, %arg1, %c0_i32_3 : i32
    %10 = arith.extui %9 : i1 to i32
    %c0_i32_4 = arith.constant 0 : i32
    %11 = arith.cmpi ne, %10, %c0_i32_4 : i32
    scf.if %11 {
      %c0_7 = arith.constant 0 : index
      %c0_8 = arith.constant 0 : index
      %15 = vector.load %arg8[%c0_7, %c0_8] : memref<128x128xf32, #tpu.memory_space<vmem>>, vector<128x128xf32>
      %16 = arith.addf %15, %5 : vector<128x128xf32>
      %c0_9 = arith.constant 0 : index
      %c0_10 = arith.constant 0 : index
      %17 = vector.load %arg8[%c0_9, %c0_10] : memref<128x128xf32, #tpu.memory_space<vmem>>, vector<128x128xf32>
      tpu.vector_store %arg8[%c0_9, %c0_10], %16 {strides = array<i32>} : memref<128x128xf32, #tpu.memory_space<vmem>>, vector<128x128xf32>,
    } else {
    }
    %c0_i32_5 = arith.constant 0 : i32
    %12 = arith.cmpi eq, %arg1, %c0_i32_5 : i32
    %13 = arith.extui %12 : i1 to i32
    %c0_i32_6 = arith.constant 0 : i32
    %14 = arith.cmpi ne, %13, %c0_i32_6 : i32
    scf.if %14 {
      %c0_7 = arith.constant 0 : index
      %c0_8 = arith.constant 0 : index
      %15 = vector.load %arg8[%c0_7, %c0_8] : memref<128x128xf32, #tpu.memory_space<vmem>>, vector<128x128xf32>
      %c0_9 = arith.constant 0 : index
      %c0_10 = arith.constant 0 : index
      %16 = vector.load %arg4[%c0_9, %c0_10] : memref<128x128xf32, #tpu.memory_space<vmem>>, vector<128x128xf32>
      %17 = arith.addf %15, %16 : vector<128x128xf32>
      %c0_11 = arith.constant 0 : index
      %c0_12 = arith.constant 0 : index
      %18 = vector.load %arg5[%c0_11, %c0_12] : memref<128x128xf32, #tpu.memory_space<vmem>>, vector<128x128xf32>
      tpu.vector_store %arg5[%c0_11, %c0_12], %17 {strides = array<i32>} : memref<128x128xf32, #tpu.memory_space<vmem>>, vector<128x128xf32>,
      %cst_13 = arith.constant dense<0.000000e+00> : vector<128xf32>
      %19 = vector.multi_reduction <add>, %17, %cst_13 [0] : vector<128x128xf32> to vector<128xf32>
      %20 = vector.shape_cast %19 : vector<128xf32> to vector<1x128xf32>
      %21 = vector.shape_cast %20 : vector<1x128xf32> to vector<1x1x128xf32>
      %c0_14 = arith.constant 0 : index
      %c0_15 = arith.constant 0 : index
      %c0_16 = arith.constant 0 : index
      %22 = vector.load %arg6[%c0_14, %c0_15, %c0_16] : memref<1x1x128xf32, #tpu.memory_space<vmem>>, vector<1x1x128xf32>
      tpu.vector_store %arg6[%c0_14, %c0_15, %c0_16], %21 {strides = array<i32>} : memref<1x1x128xf32, #tpu.memory_space<vmem>>, vector<1x1x128xf32>,
      %23 = arith.mulf %17, %17 : vector<128x128xf32>
      %cst_17 = arith.constant dense<0.000000e+00> : vector<128xf32>
      %24 = vector.multi_reduction <add>, %23, %cst_17 [0] : vector<128x128xf32> to vector<128xf32>
      %25 = vector.shape_cast %24 : vector<128xf32> to vector<1x128xf32>
      %26 = vector.shape_cast %25 : vector<1x128xf32> to vector<1x1x128xf32>
      %c0_18 = arith.constant 0 : index
      %c0_19 = arith.constant 0 : index
      %c0_20 = arith.constant 0 : index
      %27 = vector.load %arg7[%c0_18, %c0_19, %c0_20] : memref<1x1x128xf32, #tpu.memory_space<vmem>>, vector<1x1x128xf32>
      tpu.vector_store %arg7[%c0_18, %c0_19, %c0_20], %26 {strides = array<i32>} : memref<1x1x128xf32, #tpu.memory_space<vmem>>, vector<1x1x128xf32>,
    } else {
    }
    return
  }
  func.func @transform_0(%arg0: i32, %arg1: i32) -> (i32, i32) {
    %c0_i32 = arith.constant 0 : i32
    return %arg0, %arg1 : i32, i32
  }
  func.func @transform_1(%arg0: i32, %arg1: i32) -> (i32, i32) {
    %c0_i32 = arith.constant 0 : i32
    %c0_i32_0 = arith.constant 0 : i32
    %c0_i32_1 = arith.constant 0 : i32
    return %c0_i32, %c0_i32_0 : i32, i32
  }
  func.func @transform_2(%arg0: i32, %arg1: i32) -> (i32, i32) {
    %c0_i32 = arith.constant 0 : i32
    %c0_i32_0 = arith.constant 0 : i32
    return %arg0, %c0_i32 : i32, i32
  }
  func.func @transform_3(%arg0: i32, %arg1: i32) -> (i32, i32) {
    %c0_i32 = arith.constant 0 : i32
    %c0_i32_0 = arith.constant 0 : i32
    return %arg0, %c0_i32 : i32, i32
  }
  func.func @transform_4(%arg0: i32, %arg1: i32) -> (i32, i32, i32) {
    %c0_i32 = arith.constant 0 : i32
    %c0_i32_0 = arith.constant 0 : i32
    %c0_i32_1 = arith.constant 0 : i32
    return %arg0, %c0_i32, %c0_i32_0 : i32, i32, i32
  }
  func.func @transform_5(%arg0: i32, %arg1: i32) -> (i32, i32, i32) {
    %c0_i32 = arith.constant 0 : i32
    %c0_i32_0 = arith.constant 0 : i32
    %c0_i32_1 = arith.constant 0 : i32
    return %arg0, %c0_i32, %c0_i32_0 : i32, i32, i32
  }
}

module attributes {stable_mosaic.version = 11 : i64} {
  func.func @feature_matmul_kernel(%arg0: i32, %arg1: memref<128x128xbf16, #tpu.memory_space<vmem>>, %arg2: memref<128x128xbf16, #tpu.memory_space<vmem>>, %arg3: memref<128x128xbf16, #tpu.memory_space<vmem>>) attributes {dimension_semantics = [#tpu.dimension_semantics<parallel>], iteration_bounds = array<i64: 1>, scalar_prefetch = 0 : i64, scratch_operands = 0 : i64, tpu.core_type = #tpu.core_type<tc>, window_params = [{transform_indices = @transform_0, window_bounds = array<i64: 128, 128>}, {pipeline_mode = #tpu.pipeline_mode<synchronous>, transform_indices = @transform_1, window_bounds = array<i64: 128, 128>}, {transform_indices = @transform_2, window_bounds = array<i64: 128, 128>}]} {
    %c0 = arith.constant 0 : index
    %c0_0 = arith.constant 0 : index
    %0 = vector.load %arg1[%c0, %c0_0] : memref<128x128xbf16, #tpu.memory_space<vmem>>, vector<128x128xbf16>
    %c0_1 = arith.constant 0 : index
    %c0_2 = arith.constant 0 : index
    %1 = vector.load %arg2[%c0_1, %c0_2] : memref<128x128xbf16, #tpu.memory_space<vmem>>, vector<128x128xbf16>
    %cst = arith.constant dense<0.000000e+00> : vector<128x128xf32>
    %2 = tpu.matmul %0, %1, %cst {dimension_numbers = #tpu.dot_dimension_numbers<[1], [0], [0], [1], [0, 0, 1, 1], [], []>} : vector<128x128xbf16>, vector<128x128xbf16>, vector<128x128xf32> -> vector<128x128xf32>
    %3 = arith.truncf %2 : vector<128x128xf32> to vector<128x128xbf16>
    %c0_3 = arith.constant 0 : index
    %c0_4 = arith.constant 0 : index
    %4 = vector.load %arg3[%c0_3, %c0_4] : memref<128x128xbf16, #tpu.memory_space<vmem>>, vector<128x128xbf16>
    tpu.vector_store %arg3[%c0_3, %c0_4], %3 {strides = array<i32>} : memref<128x128xbf16, #tpu.memory_space<vmem>>, vector<128x128xbf16>,
    return
  }
  func.func @transform_0(%arg0: i32) -> (i32, i32) {
    %c0_i32 = arith.constant 0 : i32
    %c0_i32_0 = arith.constant 0 : i32
    return %arg0, %c0_i32 : i32, i32
  }
  func.func @transform_1(%arg0: i32) -> (i32, i32) {
    %c0_i32 = arith.constant 0 : i32
    %c0_i32_0 = arith.constant 0 : i32
    %c0_i32_1 = arith.constant 0 : i32
    return %c0_i32, %c0_i32_0 : i32, i32
  }
  func.func @transform_2(%arg0: i32) -> (i32, i32) {
    %c0_i32 = arith.constant 0 : i32
    %c0_i32_0 = arith.constant 0 : i32
    return %arg0, %c0_i32 : i32, i32
  }
}

module attributes {stable_mosaic.version = 11 : i64} {
  func.func @bn_relu_kernel(%arg0: i32, %arg1: memref<128x128xf32, #tpu.memory_space<vmem>>, %arg2: memref<1x128xf32, #tpu.memory_space<vmem>>, %arg3: memref<1x128xf32, #tpu.memory_space<vmem>>, %arg4: memref<128x128xf32, #tpu.memory_space<vmem>>) attributes {dimension_semantics = [#tpu.dimension_semantics<parallel>], iteration_bounds = array<i64: 1>, scalar_prefetch = 0 : i64, scratch_operands = 0 : i64, tpu.core_type = #tpu.core_type<tc>, window_params = [{transform_indices = @transform_0, window_bounds = array<i64: 128, 128>}, {pipeline_mode = #tpu.pipeline_mode<synchronous>, transform_indices = @transform_1, window_bounds = array<i64: 1, 128>}, {pipeline_mode = #tpu.pipeline_mode<synchronous>, transform_indices = @transform_2, window_bounds = array<i64: 1, 128>}, {transform_indices = @transform_3, window_bounds = array<i64: 128, 128>}]} {
    %c0 = arith.constant 0 : index
    %c0_0 = arith.constant 0 : index
    %0 = vector.load %arg1[%c0, %c0_0] : memref<128x128xf32, #tpu.memory_space<vmem>>, vector<128x128xf32>
    %c0_1 = arith.constant 0 : index
    %c0_2 = arith.constant 0 : index
    %1 = vector.load %arg2[%c0_1, %c0_2] : memref<1x128xf32, #tpu.memory_space<vmem>>, vector<1x128xf32>
    %2 = vector.broadcast %1 : vector<1x128xf32> to vector<128x128xf32>
    %3 = arith.mulf %0, %2 : vector<128x128xf32>
    %c0_3 = arith.constant 0 : index
    %c0_4 = arith.constant 0 : index
    %4 = vector.load %arg3[%c0_3, %c0_4] : memref<1x128xf32, #tpu.memory_space<vmem>>, vector<1x128xf32>
    %5 = vector.broadcast %4 : vector<1x128xf32> to vector<128x128xf32>
    %6 = arith.addf %3, %5 : vector<128x128xf32>
    %cst = arith.constant 0.000000e+00 : f32
    %7 = vector.broadcast %cst : f32 to vector<128x128xf32>
    %8 = arith.maximumf %6, %7 : vector<128x128xf32>
    %c0_5 = arith.constant 0 : index
    %c0_6 = arith.constant 0 : index
    %9 = vector.load %arg4[%c0_5, %c0_6] : memref<128x128xf32, #tpu.memory_space<vmem>>, vector<128x128xf32>
    tpu.vector_store %arg4[%c0_5, %c0_6], %8 {strides = array<i32>} : memref<128x128xf32, #tpu.memory_space<vmem>>, vector<128x128xf32>,
    return
  }
  func.func @transform_0(%arg0: i32) -> (i32, i32) {
    %c0_i32 = arith.constant 0 : i32
    %c0_i32_0 = arith.constant 0 : i32
    return %arg0, %c0_i32 : i32, i32
  }
  func.func @transform_1(%arg0: i32) -> (i32, i32) {
    %c0_i32 = arith.constant 0 : i32
    %c0_i32_0 = arith.constant 0 : i32
    %c0_i32_1 = arith.constant 0 : i32
    return %c0_i32, %c0_i32_0 : i32, i32
  }
  func.func @transform_2(%arg0: i32) -> (i32, i32) {
    %c0_i32 = arith.constant 0 : i32
    %c0_i32_0 = arith.constant 0 : i32
    %c0_i32_1 = arith.constant 0 : i32
    return %c0_i32, %c0_i32_0 : i32, i32
  }
  func.func @transform_3(%arg0: i32) -> (i32, i32) {
    %c0_i32 = arith.constant 0 : i32
    %c0_i32_0 = arith.constant 0 : i32
    return %arg0, %c0_i32 : i32, i32
  }
}

</mosaic_0001>

<bundles_post_ra>
// kernel: op_module_forward.5
= control target key start
LH: loop header
LB: loop body
LE: loop exit
PB: predicated region body
PF: predicated region fallthrough
CT: control target
= control target key end

     0   :  { %s254_s0 = inlined_call_operand.vmem [shape: f32[128,128], index: 0, kind: input, shape index: {}]   ;;  %s255_s1 = inlined_call_operand.vmem [shape: f32[1,128], index: 1, kind: input, shape index: {}]   ;;  %s256_s2 = inlined_call_operand.vmem [shape: f32[1,128], index: 2, kind: input, shape index: {}]   ;;  %s257_s3 = inlined_call_operand.vmem [shape: f32[128,128], index: 3, kind: output, shape index: {}]  }
   0x1   :  { %v14_v0 = vld [vmem:[%s254_s0] sm:$0xff]  ;;  %v15_v4 = vld [vmem:[%s254_s0 + $0x8] sm:$0xff]  ;;  %v16_v5 = vld [vmem:[%s254_s0 + $0x10] sm:$0xff] }
   0x2   :  { %v112_v1 = vld [vmem:[%s255_s1] ss:$0 sm:$0xff]  ;;  %v17_v6 = vld [vmem:[%s254_s0 + $0x18] sm:$0xff]  ;;  %v19_v11 = vld [vmem:[%s254_s0 + $0x28] sm:$0xff] }
   0x3   :  { %v143_v2 = vld [vmem:[%s256_s2] ss:$0 sm:$0xff]  ;;  %v37_v3 = vmul.f32 %v112_v1, %v14_v0  ;;  %v38_v7 = vmul.f32 %v112_v1, %v15_v4  ;;  %v39_v8 = vmul.f32 %v112_v1, %v16_v5  ;;  %v40_v9 = vmul.f32 %v112_v1, %v17_v6  ;;  %v20_v12 = vld [vmem:[%s254_s0 + $0x30] sm:$0xff]  ;;  %v21_v17 = vld [vmem:[%s254_s0 + $0x38] sm:$0xff] }
   0x4   :  { %v18_v10 = vld [vmem:[%s254_s0 + $0x20] sm:$0xff]  ;;  %v42_v15 = vmul.f32 %v112_v1, %v19_v11  ;;  %v43_v16 = vmul.f32 %v112_v1, %v20_v12  ;;  %v44_v21 = vmul.f32 %v112_v1, %v21_v17  ;;  %v23_v27 = vld [vmem:[%s254_s0 + $0x48] sm:$0xff]  ;;  %v24_v28 = vld [vmem:[%s254_s0 + $0x50] sm:$0xff] }
   0x5   :  { %v60_v13 = vadd.f32 %v143_v2, %v37_v3  ;;  %v41_v14 = vmul.f32 %v112_v1, %v18_v10  ;;  %v61_v18 = vadd.f32 %v143_v2, %v38_v7  ;;  %v62_v19 = vadd.f32 %v143_v2, %v39_v8  ;;  %v22_v22 = vld [vmem:[%s254_s0 + $0x40] sm:$0xff]  ;;  %v25_v29 = vld [vmem:[%s254_s0 + $0x58] sm:$0xff]  ;;  %v27_v35 = vld [vmem:[%s254_s0 + $0x68] sm:$0xff] }
   0x6   :  { %v63_v20 = vadd.f32 %v143_v2, %v40_v9  ;;  %v65_v25 = vadd.f32 %v143_v2, %v42_v15  ;;  %v66_v26 = vadd.f32 %v143_v2, %v43_v16  ;;  %v67_v33 = vadd.f32 %v143_v2, %v44_v21  ;;  %v26_v34 = vld [vmem:[%s254_s0 + $0x60] sm:$0xff]  ;;  %v28_v36 = vld [vmem:[%s254_s0 + $0x70] sm:$0xff]  ;;  %v29_v41 = vld [vmem:[%s254_s0 + $0x78] sm:$0xff] }
   0x7   :  { %v76_v23 = vmax.f32 %v60_v13, 0.0  ;;  %v64_v24 = vadd.f32 %v143_v2, %v41_v14  ;;  %v77_v30 = vmax.f32 %v61_v18, 0.0  ;;  %v78_v31 = vmax.f32 %v62_v19, 0.0 }
   0x8   :  { %v79_v32 = vmax.f32 %v63_v20, 0.0  ;;  %v81_v38 = vmax.f32 %v65_v25, 0.0  ;;  %v82_v39 = vmax.f32 %v66_v26, 0.0  ;;  %v45_v40 = vmul.f32 %v112_v1, %v22_v22 }
   0x9   :  { %92 = vst [vmem:[%s257_s3] sm:$0xff] %v76_v23  ;;  %v80_v37 = vmax.f32 %v64_v24, 0.0  ;;  %93 = vst [vmem:[%s257_s3 + $0x8] sm:$0xff] %v77_v30  ;;  %v83_v42 = vmax.f32 %v67_v33, 0.0  ;;  %v46_v43 = vmul.f32 %v112_v1, %v23_v27  ;;  %v47_v44 = vmul.f32 %v112_v1, %v24_v28 }
   0xa   :  { %94 = vst [vmem:[%s257_s3 + $0x10] sm:$0xff] %v78_v31  ;;  %95 = vst [vmem:[%s257_s3 + $0x18] sm:$0xff] %v79_v32  ;;  %v48_v45 = vmul.f32 %v112_v1, %v25_v29  ;;  %v68_v46 = vadd.f32 %v143_v2, %v45_v40  ;;  %v49_v47 = vmul.f32 %v112_v1, %v26_v34 }
   0xb   :  { %96 = vst [vmem:[%s257_s3 + $0x20] sm:$0xff] %v80_v37  ;;  %97 = vst [vmem:[%s257_s3 + $0x28] sm:$0xff] %v81_v38  ;;  %v50_v48 = vmul.f32 %v112_v1, %v27_v35  ;;  %v51_v49 = vmul.f32 %v112_v1, %v28_v36  ;;  %v69_v50 = vadd.f32 %v143_v2, %v46_v43 }
   0xc   :  { %98 = vst [vmem:[%s257_s3 + $0x30] sm:$0xff] %v82_v39  ;;  %99 = vst [vmem:[%s257_s3 + $0x38] sm:$0xff] %v83_v42  ;;  %v70_v51 = vadd.f32 %v143_v2, %v47_v44  ;;  %v71_v52 = vadd.f32 %v143_v2, %v48_v45  ;;  %v52_v53 = vmul.f32 %v112_v1, %v29_v41  ;;  %v84_v54 = vmax.f32 %v68_v46, 0.0 }
   0xd   :  { %v72_v55 = vadd.f32 %v143_v2, %v49_v47  ;;  %v73_v56 = vadd.f32 %v143_v2, %v50_v48  ;;  %v74_v57 = vadd.f32 %v143_v2, %v51_v49  ;;  %v85_v58 = vmax.f32 %v69_v50, 0.0 }
   0xe   :  { %v86_v59 = vmax.f32 %v70_v51, 0.0  ;;  %v87_v60 = vmax.f32 %v71_v52, 0.0  ;;  %v75_v61 = vadd.f32 %v143_v2, %v52_v53  ;;  %100 = vst [vmem:[%s257_s3 + $0x40] sm:$0xff] %v84_v54 }
   0xf   :  { %v88_v62 = vmax.f32 %v72_v55, 0.0  ;;  %v89_v63 = vmax.f32 %v73_v56, 0.0  ;;  %v90_v0 = vmax.f32 %v74_v57, 0.0  ;;  %101 = vst [vmem:[%s257_s3 + $0x48] sm:$0xff] %v85_v58 }
  0x10   :  { %102 = vst [vmem:[%s257_s3 + $0x50] sm:$0xff] %v86_v59  ;;  %103 = vst [vmem:[%s257_s3 + $0x58] sm:$0xff] %v87_v60  ;;  %v91_v1 = vmax.f32 %v75_v61, 0.0 }
  0x11   :  { %104 = vst [vmem:[%s257_s3 + $0x60] sm:$0xff] %v88_v62  ;;  %105 = vst [vmem:[%s257_s3 + $0x68] sm:$0xff] %v89_v63 }
  0x12   :  { %106 = vst [vmem:[%s257_s3 + $0x70] sm:$0xff] %v90_v0  ;;  %107 = vst [vmem:[%s257_s3 + $0x78] sm:$0xff] %v91_v1 }

// kernel: op_module_forward.3
= control target key start
LH: loop header
LB: loop body
LE: loop exit
PB: predicated region body
PF: predicated region fallthrough
CT: control target
= control target key end

     0   :  { %s583_s1 = inlined_call_operand.vmem [shape: bf16[128,128], index: 1, kind: input, shape index: {}]   ;;  %s584_s0 = inlined_call_operand.vmem [shape: bf16[128,128], index: 0, kind: input, shape index: {}]   ;;  %s585_s2 = inlined_call_operand.vmem [shape: bf16[128,128], index: 2, kind: output, shape index: {}]  }
   0x1   :  { %v480_v0 = vld [vmem:[%s583_s1] sm:$0xff]   ;;  %v481_v1 = vld [vmem:[%s583_s1 + $0x8] sm:$0xff]   ;;  %v482_v2 = vld [vmem:[%s583_s1 + $0x10] sm:$0xff]  }
   0x2   :  { %432 = vmatprep.subr.bf16.mxu0 %v480_v0  ;;  %464 = vmatprep.subr.bf16.mxu1 %v480_v0  ;;  %v483_v3 = vld [vmem:[%s583_s1 + $0x18] sm:$0xff]   ;;  %v488_v4 = vld [vmem:[%s584_s0] sm:$0xff]   ;;  %v485_v7 = vld [vmem:[%s583_s1 + $0x28] sm:$0xff]  }
   0x3   :  { %433 = vmatpush3.bf16.msra.mxu0 %v480_v0  ;;  %472 = vmatpush3.bf16.msra.mxu1 %v480_v0  ;;  %v489_v5 = vld [vmem:[%s584_s0 + $0x20] sm:$0xff]   ;;  %v486_v8 = vld [vmem:[%s583_s1 + $0x30] sm:$0xff]   ;;  %v487_v9 = vld [vmem:[%s583_s1 + $0x38] sm:$0xff]  }
   0x4   :  { %434 = vmatprep.subr.bf16.mxu0 %v481_v1  ;;  %465 = vmatprep.subr.bf16.mxu1 %v481_v1  ;;  %v484_v6 = vld [vmem:[%s583_s1 + $0x20] sm:$0xff]   ;;  %v490_v10 = vld [vmem:[%s584_s0 + $0x8] sm:$0xff]   ;;  %v492_v12 = vld [vmem:[%s584_s0 + $0x10] sm:$0xff]  }
   0x5   :  { %448 = vmatprep.mubr.bf16.mxu0 %v488_v4  ;;  %456 = vmatprep.mubr.bf16.mxu1 %v489_v5  ;;  %v491_v11 = vld [vmem:[%s584_s0 + $0x28] sm:$0xff]   ;;  %v493_v13 = vld [vmem:[%s584_s0 + $0x30] sm:$0xff]   ;;  %v494_v14 = vld [vmem:[%s584_s0 + $0x18] sm:$0xff]  }
   0x6   :  { %v495_v15 = vld [vmem:[%s584_s0 + $0x38] sm:$0xff]  }
   0x7   :  { %435 = vmatpush3.bf16.msra.mxu0 %v481_v1  ;;  %473 = vmatpush3.bf16.msra.mxu1 %v481_v1 }
   0x8   :  { %436 = vmatprep.subr.bf16.mxu0 %v482_v2  ;;  %466 = vmatprep.subr.bf16.mxu1 %v482_v2 }
   0xb   :  { %437 = vmatpush3.bf16.msra.mxu0 %v482_v2  ;;  %474 = vmatpush3.bf16.msra.mxu1 %v482_v2 }
   0xc   :  { %438 = vmatprep.subr.bf16.mxu0 %v483_v3  ;;  %467 = vmatprep.subr.bf16.mxu1 %v483_v3 }
   0xf   :  { %439 = vmatpush3.bf16.msra.mxu0 %v483_v3  ;;  %475 = vmatpush3.bf16.msra.mxu1 %v483_v3 }
  0x10   :  { %440 = vmatprep.subr.bf16.mxu0 %v484_v6  ;;  %468 = vmatprep.subr.bf16.mxu1 %v484_v6 }
  0x13   :  { %441 = vmatpush3.bf16.msra.mxu0 %v484_v6  ;;  %476 = vmatpush3.bf16.msra.mxu1 %v484_v6 }
  0x14   :  { %442 = vmatprep.subr.bf16.mxu0 %v485_v7  ;;  %469 = vmatprep.subr.bf16.mxu1 %v485_v7 }
  0x17   :  { %443 = vmatpush3.bf16.msra.mxu0 %v485_v7  ;;  %477 = vmatpush3.bf16.msra.mxu1 %v485_v7 }
  0x18   :  { %444 = vmatprep.subr.bf16.mxu0 %v486_v8  ;;  %470 = vmatprep.subr.bf16.mxu1 %v486_v8 }
  0x1b   :  { %445 = vmatpush3.bf16.msra.mxu0 %v486_v8  ;;  %478 = vmatpush3.bf16.msra.mxu1 %v486_v8 }
  0x1c   :  { %446 = vmatprep.subr.bf16.mxu0 %v487_v9  ;;  %471 = vmatprep.subr.bf16.mxu1 %v487_v9 }
  0x1f   :  { %447 = vmatpush3.bf16.msra.mxu0 %v487_v9  ;;  %479 = vmatpush3.bf16.msra.mxu1 %v487_v9 }
  0x22   :  { %449 = vmatmul.mubr.bf16.vlgmr.msra.gmra.mrb[0].mxu0 %v490_v10  ;;  %457 = vmatmul.mubr.bf16.vlgmr.msra.gmra.mrb[0].mxu1 %v491_v11 }
  0x23   :  { %452 = vmatprep.mubr.bf16.mxu0 %v492_v12  ;;  %460 = vmatprep.mubr.bf16.mxu1 %v493_v13 }
  0x2a   :  { %453 = vmatmul.mubr.bf16.gmra.mrb[4].mxu0 %v494_v14  ;;  %461 = vmatmul.mubr.bf16.gmra.mrb[4].mxu1 %v495_v15 }
  0xf5   :  { %v450_v16 = vpop.f32.mrb[0].mxu0  ;;  %v458_v17 = vpop.f32.mrb[0].mxu1 }
  0xf6   :  { %v174_v18 = vpop.f32.mrb[1].mxu0  ;;  %v206_v19 = vpop.f32.mrb[1].mxu1 }
  0xf7   :  { %v451_v20 = vpop.f32.mrb[2].mxu0  ;;  %v459_v21 = vpop.f32.mrb[2].mxu1 }
  0xf8   :  { %v377_v22 = vpack.c.bf16 %v451_v20, %v450_v16  ;;  %v397_v23 = vpack.c.bf16 %v459_v21, %v458_v17  ;;  %v177_v24 = vpop.f32.mrb[3].mxu0  ;;  %v209_v25 = vpop.f32.mrb[3].mxu1 }
  0xf9   :  { %v372_v26 = vpack.c.bf16 %v177_v24, %v174_v18  ;;  %v392_v27 = vpack.c.bf16 %v209_v25, %v206_v19 }
  0xfa   :  { %409 = vst [vmem:[%s585_s2 + $0x8] sm:$0xff] %v377_v22   ;;  %413 = vst [vmem:[%s585_s2 + $0x28] sm:$0xff] %v397_v23  }
  0xfb   :  { %373 = vst [vmem:[%s585_s2] sm:$0xff] %v372_v26   ;;  %412 = vst [vmem:[%s585_s2 + $0x20] sm:$0xff] %v392_v27  }
  0xfd   :  { %v454_v28 = vpop.f32.mrb[4].mxu0  ;;  %v462_v29 = vpop.f32.mrb[4].mxu1 }
  0xfe   :  { %v190_v30 = vpop.f32.mrb[5].mxu0  ;;  %v222_v31 = vpop.f32.mrb[5].mxu1 }
  0xff   :  { %v455_v32 = vpop.f32.mrb[6].mxu0  ;;  %v463_v33 = vpop.f32.mrb[6].mxu1 }
 0x100   :  { %v387_v34 = vpack.c.bf16 %v455_v32, %v454_v28  ;;  %v407_v35 = vpack.c.bf16 %v463_v33, %v462_v29  ;;  %v193_v36 = vpop.f32.mrb[7].mxu0  ;;  %v225_v37 = vpop.f32.mrb[7].mxu1 }
 0x101   :  { %v382_v38 = vpack.c.bf16 %v193_v36, %v190_v30  ;;  %v402_v39 = vpack.c.bf16 %v225_v37, %v222_v31 }
 0x102   :  { %411 = vst [vmem:[%s585_s2 + $0x18] sm:$0xff] %v387_v34   ;;  %415 = vst [vmem:[%s585_s2 + $0x38] sm:$0xff] %v407_v35  }
 0x103   :  { %410 = vst [vmem:[%s585_s2 + $0x10] sm:$0xff] %v382_v38   ;;  %414 = vst [vmem:[%s585_s2 + $0x30] sm:$0xff] %v402_v39  }

// kernel: op_module_forward.4
= control target key start
LH: loop header
LB: loop body
LE: loop exit
PB: predicated region body
PF: predicated region fallthrough
CT: control target
= control target key end

     0   :  { %s755_s1 = inlined_call_operand.vmem [shape: bf16[128,128], index: 1, kind: input, shape index: {}]   ;;  %s756_s0 = inlined_call_operand.vmem [shape: bf16[128,128], index: 0, kind: input, shape index: {}]   ;;  %s757_s2 = inlined_call_operand.vmem [shape: f32[128,128], index: 2, kind: input, shape index: {}]   ;;  %s758_s3 = inlined_call_operand.vmem [shape: f32[128,128], index: 3, kind: output, shape index: {0}]   ;;  %s759_s4 = inlined_call_operand.vmem [shape: f32[1,1,128], index: 4, kind: output, shape index: {1}]   ;;  %s760_s5 = inlined_call_operand.vmem [shape: f32[1,1,128], index: 5, kind: output, shape index: {2}]  }
   0x1   :  { %v541_v0 = vld [vmem:[%s755_s1] sm:$0xff]   ;;  %v542_v1 = vld [vmem:[%s755_s1 + $0x8] sm:$0xff]   ;;  %v543_v2 = vld [vmem:[%s755_s1 + $0x10] sm:$0xff]  }
   0x2   :  { %493 = vmatprep.subr.bf16.mxu0 %v541_v0  ;;  %525 = vmatprep.subr.bf16.mxu1 %v541_v0  ;;  %v544_v3 = vld [vmem:[%s755_s1 + $0x18] sm:$0xff]   ;;  %v549_v4 = vld [vmem:[%s756_s0] sm:$0xff]   ;;  %v546_v7 = vld [vmem:[%s755_s1 + $0x28] sm:$0xff]  }
   0x3   :  { %494 = vmatpush3.bf16.msra.mxu0 %v541_v0  ;;  %533 = vmatpush3.bf16.msra.mxu1 %v541_v0  ;;  %v545_v5 = vld [vmem:[%s755_s1 + $0x20] sm:$0xff]   ;;  %v547_v8 = vld [vmem:[%s755_s1 + $0x30] sm:$0xff]   ;;  %v548_v9 = vld [vmem:[%s755_s1 + $0x38] sm:$0xff]  }
   0x4   :  { %495 = vmatprep.subr.bf16.mxu0 %v542_v1  ;;  %526 = vmatprep.subr.bf16.mxu1 %v542_v1  ;;  %v553_v6 = vld [vmem:[%s756_s0 + $0x20] sm:$0xff]   ;;  %v550_v10 = vld [vmem:[%s756_s0 + $0x8] sm:$0xff]   ;;  %v551_v12 = vld [vmem:[%s756_s0 + $0x10] sm:$0xff]  }
   0x5   :  { %509 = vmatprep.mubr.bf16.mxu0 %v549_v4  ;;  %517 = vmatprep.mubr.bf16.mxu1 %v553_v6  ;;  %v554_v11 = vld [vmem:[%s756_s0 + $0x28] sm:$0xff]   ;;  %v555_v13 = vld [vmem:[%s756_s0 + $0x30] sm:$0xff]   ;;  %v552_v14 = vld [vmem:[%s756_s0 + $0x18] sm:$0xff]  }
   0x6   :  { %v556_v15 = vld [vmem:[%s756_s0 + $0x38] sm:$0xff]   ;;  %v341_v16 = vld [vmem:[%s757_s2 + $0x10] sm:$0xff]  ;;  %v339_v18 = vld [vmem:[%s757_s2] sm:$0xff] }
   0x7   :  { %496 = vmatpush3.bf16.msra.mxu0 %v542_v1  ;;  %534 = vmatpush3.bf16.msra.mxu1 %v542_v1  ;;  %v349_v17 = vld [vmem:[%s757_s2 + $0x50] sm:$0xff]  ;;  %v347_v19 = vld [vmem:[%s757_s2 + $0x40] sm:$0xff]  ;;  %v342_v21 = vld [vmem:[%s757_s2 + $0x18] sm:$0xff] }
   0x8   :  { %497 = vmatprep.subr.bf16.mxu0 %v543_v2  ;;  %527 = vmatprep.subr.bf16.mxu1 %v543_v2  ;;  %v350_v23 = vld [vmem:[%s757_s2 + $0x58] sm:$0xff]  ;;  %v340_v26 = vld [vmem:[%s757_s2 + $0x8] sm:$0xff]  ;;  %v345_v43 = vld [vmem:[%s757_s2 + $0x30] sm:$0xff] }
   0x9   :  { %v348_v29 = vld [vmem:[%s757_s2 + $0x48] sm:$0xff]  ;;  %v353_v44 = vld [vmem:[%s757_s2 + $0x70] sm:$0xff]  ;;  %v343_v45 = vld [vmem:[%s757_s2 + $0x20] sm:$0xff] }
   0xa   :  { %v351_v46 = vld [vmem:[%s757_s2 + $0x60] sm:$0xff]  ;;  %v346_v51 = vld [vmem:[%s757_s2 + $0x38] sm:$0xff]  ;;  %v344_v57 = vld [vmem:[%s757_s2 + $0x28] sm:$0xff] }
   0xb   :  { %498 = vmatpush3.bf16.msra.mxu0 %v543_v2  ;;  %535 = vmatpush3.bf16.msra.mxu1 %v543_v2  ;;  %v354_v53 = vld [vmem:[%s757_s2 + $0x78] sm:$0xff]  ;;  %v352_v2 = vld [vmem:[%s757_s2 + $0x68] sm:$0xff] }
   0xc   :  { %499 = vmatprep.subr.bf16.mxu0 %v544_v3  ;;  %528 = vmatprep.subr.bf16.mxu1 %v544_v3 }
   0xf   :  { %500 = vmatpush3.bf16.msra.mxu0 %v544_v3  ;;  %536 = vmatpush3.bf16.msra.mxu1 %v544_v3 }
  0x10   :  { %501 = vmatprep.subr.bf16.mxu0 %v545_v5  ;;  %529 = vmatprep.subr.bf16.mxu1 %v545_v5 }
  0x13   :  { %502 = vmatpush3.bf16.msra.mxu0 %v545_v5  ;;  %537 = vmatpush3.bf16.msra.mxu1 %v545_v5 }
  0x14   :  { %503 = vmatprep.subr.bf16.mxu0 %v546_v7  ;;  %530 = vmatprep.subr.bf16.mxu1 %v546_v7 }
  0x17   :  { %504 = vmatpush3.bf16.msra.mxu0 %v546_v7  ;;  %538 = vmatpush3.bf16.msra.mxu1 %v546_v7 }
  0x18   :  { %505 = vmatprep.subr.bf16.mxu0 %v547_v8  ;;  %531 = vmatprep.subr.bf16.mxu1 %v547_v8 }
  0x1b   :  { %506 = vmatpush3.bf16.msra.mxu0 %v547_v8  ;;  %539 = vmatpush3.bf16.msra.mxu1 %v547_v8 }
  0x1c   :  { %507 = vmatprep.subr.bf16.mxu0 %v548_v9  ;;  %532 = vmatprep.subr.bf16.mxu1 %v548_v9 }
  0x1f   :  { %508 = vmatpush3.bf16.msra.mxu0 %v548_v9  ;;  %540 = vmatpush3.bf16.msra.mxu1 %v548_v9 }
  0x22   :  { %510 = vmatmul.mubr.bf16.vlgmr.msra.gmra.mrb[0].mxu0 %v550_v10  ;;  %518 = vmatmul.mubr.bf16.vlgmr.msra.gmra.mrb[0].mxu1 %v554_v11 }
  0x23   :  { %513 = vmatprep.mubr.bf16.mxu0 %v551_v12  ;;  %521 = vmatprep.mubr.bf16.mxu1 %v555_v13 }
  0x2a   :  { %514 = vmatmul.mubr.bf16.gmra.mrb[4].mxu0 %v552_v14  ;;  %522 = vmatmul.mubr.bf16.gmra.mrb[4].mxu1 %v556_v15 }
  0xf5   :  { %v511_v20 = vpop.f32.mrb[0].mxu0  ;;  %v519_v22 = vpop.f32.mrb[0].mxu1 }
  0xf6   :  { %v357_v24 = vadd.f32 %v511_v20, %v341_v16  ;;  %v185_v25 = vpop.f32.mrb[1].mxu0  ;;  %v656_v27 = vadd.f32 %v519_v22, %v349_v17  ;;  %v217_v28 = vpop.f32.mrb[1].mxu1 }
  0xf7   :  { %v355_v30 = vadd.f32 %v339_v18, %v185_v25  ;;  %v512_v31 = vpop.f32.mrb[2].mxu0  ;;  %v661_v32 = vadd.f32 %v347_v19, %v217_v28  ;;  %v520_v33 = vpop.f32.mrb[2].mxu1 }
  0xf8   :  { %373 = vst [vmem:[%s758_s3 + $0x10] sm:$0xff] %v357_v24  ;;  %v358_v34 = vadd.f32 %v512_v31, %v342_v21  ;;  %v188_v35 = vpop.f32.mrb[3].mxu0  ;;  %381 = vst [vmem:[%s758_s3 + $0x50] sm:$0xff] %v656_v27  ;;  %v670_v36 = vadd.f32 %v520_v33, %v350_v23  ;;  %v220_v37 = vpop.f32.mrb[3].mxu1  ;;  %v411_v47 = vmul.f32 %v357_v24, %v357_v24 }
  0xf9   :  { %371 = vst [vmem:[%s758_s3] sm:$0xff] %v355_v30  ;;  %v356_v38 = vadd.f32 %v340_v26, %v188_v35  ;;  %379 = vst [vmem:[%s758_s3 + $0x40] sm:$0xff] %v661_v32  ;;  %v364_v39 = vadd.f32 %v348_v29, %v220_v37  ;;  %v409_v40 = vmul.f32 %v355_v30, %v355_v30 }
  0xfa   :  { %374 = vst [vmem:[%s758_s3 + $0x18] sm:$0xff] %v358_v34  ;;  %382 = vst [vmem:[%s758_s3 + $0x58] sm:$0xff] %v670_v36  ;;  %v412_v54 = vmul.f32 %v358_v34, %v358_v34  ;;  %v417_v21 = vmul.f32 %v661_v32, %v661_v32  ;;  %v419_v28 = vmul.f32 %v656_v27, %v656_v27 }
  0xfb   :  { %372 = vst [vmem:[%s758_s3 + $0x8] sm:$0xff] %v356_v38  ;;  %v387_v41 = vadd.f32 %v356_v38, %v355_v30  ;;  %v410_v42 = vmul.f32 %v356_v38, %v356_v38  ;;  %380 = vst [vmem:[%s758_s3 + $0x48] sm:$0xff] %v364_v39  ;;  %v418_v26 = vmul.f32 %v364_v39, %v364_v39 }
  0xfc   :  { %v420_v31 = vmul.f32 %v670_v36, %v670_v36 }
  0xfd   :  { %v388_v48 = vadd.f32 %v387_v41, %v357_v24  ;;  %v425_v49 = vadd.f32 %v410_v42, %v409_v40  ;;  %v515_v50 = vpop.f32.mrb[4].mxu0  ;;  %v523_v52 = vpop.f32.mrb[4].mxu1 }
  0xfe   :  { %v361_v55 = vadd.f32 %v515_v50, %v345_v43  ;;  %v201_v56 = vpop.f32.mrb[5].mxu0  ;;  %v369_v58 = vadd.f32 %v523_v52, %v353_v44  ;;  %v233_v59 = vpop.f32.mrb[5].mxu1 }
  0xff   :  { %v426_v60 = vadd.f32 %v425_v49, %v411_v47  ;;  %v359_v61 = vadd.f32 %v343_v45, %v201_v56  ;;  %v389_v62 = vadd.f32 %v388_v48, %v358_v34  ;;  %v516_v63 = vpop.f32.mrb[6].mxu0  ;;  %v367_v0 = vadd.f32 %v351_v46, %v233_v59  ;;  %v524_v1 = vpop.f32.mrb[6].mxu1 }
 0x100   :  { %377 = vst [vmem:[%s758_s3 + $0x30] sm:$0xff] %v361_v55  ;;  %v362_v3 = vadd.f32 %v516_v63, %v346_v51  ;;  %v204_v4 = vpop.f32.mrb[7].mxu0  ;;  %385 = vst [vmem:[%s758_s3 + $0x70] sm:$0xff] %v369_v58  ;;  %v370_v5 = vadd.f32 %v524_v1, %v354_v53  ;;  %v236_v6 = vpop.f32.mrb[7].mxu1  ;;  %v415_v15 = vmul.f32 %v361_v55, %v361_v55 }
 0x101   :  { %375 = vst [vmem:[%s758_s3 + $0x20] sm:$0xff] %v359_v61  ;;  %v390_v7 = vadd.f32 %v389_v62, %v359_v61  ;;  %v413_v8 = vmul.f32 %v359_v61, %v359_v61  ;;  %v427_v9 = vadd.f32 %v426_v60, %v412_v54  ;;  %v360_v10 = vadd.f32 %v344_v57, %v204_v4 }
 0x102   :  { %383 = vst [vmem:[%s758_s3 + $0x60] sm:$0xff] %v367_v0  ;;  %378 = vst [vmem:[%s758_s3 + $0x38] sm:$0xff] %v362_v3  ;;  %v368_v11 = vadd.f32 %v352_v2, %v236_v6  ;;  %v416_v18 = vmul.f32 %v362_v3, %v362_v3  ;;  %v421_v35 = vmul.f32 %v367_v0, %v367_v0 }
 0x103   :  { %386 = vst [vmem:[%s758_s3 + $0x78] sm:$0xff] %v370_v5  ;;  %v428_v12 = vadd.f32 %v427_v9, %v413_v8  ;;  %376 = vst [vmem:[%s758_s3 + $0x28] sm:$0xff] %v360_v10  ;;  %v391_v13 = vadd.f32 %v390_v7, %v360_v10  ;;  %v414_v14 = vmul.f32 %v360_v10, %v360_v10 }
 0x104   :  { %384 = vst [vmem:[%s758_s3 + $0x68] sm:$0xff] %v368_v11  ;;  %v422_v41 = vmul.f32 %v368_v11, %v368_v11  ;;  %v423_v42 = vmul.f32 %v369_v58, %v369_v58  ;;  %v424_v44 = vmul.f32 %v370_v5, %v370_v5 }
 0x105   :  { %v392_v16 = vadd.f32 %v391_v13, %v361_v55  ;;  %v429_v17 = vadd.f32 %v428_v12, %v414_v14 }
 0x107   :  { %v430_v19 = vadd.f32 %v429_v17, %v415_v15  ;;  %v393_v20 = vadd.f32 %v392_v16, %v362_v3 }
 0x109   :  { %v394_v22 = vadd.f32 %v393_v20, %v661_v32  ;;  %v431_v23 = vadd.f32 %v430_v19, %v416_v18 }
 0x10b   :  { %v432_v24 = vadd.f32 %v431_v23, %v417_v21  ;;  %v395_v25 = vadd.f32 %v394_v22, %v364_v39 }
 0x10d   :  { %v396_v29 = vadd.f32 %v395_v25, %v656_v27  ;;  %v433_v30 = vadd.f32 %v432_v24, %v418_v26 }
 0x10f   :  { %v434_v33 = vadd.f32 %v433_v30, %v419_v28  ;;  %v397_v34 = vadd.f32 %v396_v29, %v670_v36 }
 0x111   :  { %v398_v37 = vadd.f32 %v397_v34, %v367_v0  ;;  %v435_v38 = vadd.f32 %v434_v33, %v420_v31 }
 0x113   :  { %v436_v32 = vadd.f32 %v435_v38, %v421_v35  ;;  %v399_v40 = vadd.f32 %v398_v37, %v368_v11 }
 0x115   :  { %v400_v39 = vadd.f32 %v399_v40, %v369_v58  ;;  %v437_v43 = vadd.f32 %v436_v32, %v422_v41 }
 0x117   :  { %v401_v45 = vadd.f32 %v400_v39, %v370_v5  ;;  %v438_v46 = vadd.f32 %v437_v43, %v423_v42 }
 0x119   :  { %v402_v27 = vrot.slane %v401_v45, 4  ;;  %v439_v47 = vadd.f32 %v438_v46, %v424_v44 }
 0x11b   :  { %v403_v48 = vadd.f32 %v402_v27, %v401_v45  ;;  %v440_v49 = vrot.slane %v439_v47, 4 }
 0x11d   :  { %v404_v50 = vrot.slane %v403_v48, 2  ;;  %v441_v51 = vadd.f32 %v440_v49, %v439_v47 }
 0x11f   :  { %v405_v52 = vadd.f32 %v404_v50, %v403_v48  ;;  %v442_v36 = vrot.slane %v441_v51, 2 }
 0x121   :  { %v406_v53 = vrot.slane %v405_v52, 1  ;;  %v443_v54 = vadd.f32 %v442_v36, %v441_v51 }
 0x123   :  { %v407_v55 = vadd.f32 %v406_v53, %v405_v52  ;;  %v444_v56 = vrot.slane %v443_v54, 1 }
 0x125   :  { %408 = vst [vmem:[%s759_s4] sm:$0x1] %v407_v55  ;;  %v445_v57 = vadd.f32 %v444_v56, %v443_v54 }
 0x127   :  { %446 = vst [vmem:[%s760_s5] sm:$0x1] %v445_v57 }

</bundles_post_ra>
